<compile_context>
chip_gen: v5e
topology: v5e:2x2
jax: 0.10.0
libtpu: 0.0.40
codegen_flags: <defaults>
</compile_context>

<pallas_src>
import math
import jax
import jax.numpy as jnp
from jax.experimental import pallas as pl
from jax.experimental.pallas import tpu as pltpu


# Scoped-VMEM cap: well above the 16/32 MiB scoped defaults (v5e/v6e) while
# leaving headroom under v7x's 64 MiB physical VMEM.  The tile choices below
# keep the double-buffered blocks + scratch under ~12 MiB anyway.
_VMEM_LIMIT = 48 * 1024 * 1024


def _is_v5e():
    try:
        return "v5" in jax.devices()[0].device_kind.lower()
    except Exception:
        return False


def _pick_tile(dim, prefs):
    """Largest preferred tile evenly dividing dim; fall back to the full dim."""
    for p in prefs:
        if dim % p == 0:
            return p
    return dim


# --------------------------- tiled linear: y = x @ W + b --------------------------- #
def _linear_kernel(x_ref, w_ref, b_ref, o_ref, acc_ref):
    kk = pl.program_id(2)

    @pl.when(kk == 0)
    def _():
        acc_ref[...] = jnp.zeros_like(acc_ref)

    acc_ref[...] += jnp.dot(x_ref[...], w_ref[...], preferred_element_type=jnp.float32)

    @pl.when(kk == pl.num_programs(2) - 1)
    def _():
        o_ref[...] = (acc_ref[...] + b_ref[...]).astype(o_ref.dtype)


def linear_pallas(x, w, b, *, out_dtype, compute_dtype=jnp.bfloat16):
    """x: (M, K), w: (K, N), b: (1, N) -> (M, N).

    MXU operands in `compute_dtype` (bf16), f32 accumulator + f32 bias, tiled
    over (M, N, K) with K innermost ('arbitrary'); M/N 'parallel' for megacore.
    """
    M, K = x.shape
    N = w.shape[1]
    x = x.astype(compute_dtype)
    w = w.astype(compute_dtype)
    b = b.astype(jnp.float32)
    tm = _pick_tile(M, (512, 256, 128))
    tn = _pick_tile(N, (512, 256, 128))
    tk = _pick_tile(K, (512, 256, 128))
    grid = (M // tm, N // tn, K // tk)
    return pl.pallas_call(
        _linear_kernel,
        out_shape=jax.ShapeDtypeStruct((M, N), out_dtype),
        grid=grid,
        in_specs=[
            pl.BlockSpec((tm, tk), lambda i, j, kk: (i, kk)),
            pl.BlockSpec((tk, tn), lambda i, j, kk: (kk, j)),
            pl.BlockSpec((1, tn), lambda i, j, kk: (0, j)),
        ],
        out_specs=pl.BlockSpec((tm, tn), lambda i, j, kk: (i, j)),
        scratch_shapes=[pltpu.VMEM((tm, tn), jnp.float32)],
        compiler_params=pltpu.CompilerParams(
            dimension_semantics=("parallel", "parallel", "arbitrary"),
            vmem_limit_bytes=_VMEM_LIMIT,
        ),
    )(x, w, b)


# --------------------- flash attention (online softmax, all heads) ------------------ #
def _flash_kernel(q_ref, k_ref, v_ref, o_ref, m_sc, l_sc, acc_sc):
    ki = pl.program_id(2)

    @pl.when(ki == 0)
    def _():
        m_sc[...] = jnp.full(m_sc.shape, -jnp.inf, jnp.float32)
        l_sc[...] = jnp.zeros_like(l_sc)
        acc_sc[...] = jnp.zeros_like(acc_sc)

    q = q_ref[0]        # (H, tq,  d_k)  bf16 — scale already folded into W_q
    kt = k_ref[0]       # (H, tkv, d_k)  bf16
    vt = v_ref[0]       # (H, tkv, d_k)  bf16

    # Batched over heads in a single dot_general (no per-head Python unroll).
    s = jnp.einsum("hqd,hkd->hqk", q, kt, preferred_element_type=jnp.float32)

    m_prev = m_sc[...]
    m_new = jnp.maximum(m_prev, s.max(axis=-1, keepdims=True))
    alpha = jnp.exp(m_prev - m_new)                 # f32 elementwise (v5e-safe)
    p = jnp.exp(s - m_new)
    l_sc[...] = alpha * l_sc[...] + p.sum(axis=-1, keepdims=True)
    acc_sc[...] = alpha * acc_sc[...] + jnp.einsum(
        "hqk,hkd->hqd", p.astype(vt.dtype), vt, preferred_element_type=jnp.float32)
    m_sc[...] = m_new

    @pl.when(ki == pl.num_programs(2) - 1)
    def _():
        inv_l = pl.reciprocal(l_sc[...], approx=True)   # EUP slot, ~free
        o_ref[0] = (acc_sc[...] * inv_l).astype(o_ref.dtype)


def flash_attention_pallas(q, k, v):
    """q/k/v: (bs, H, S, d_k) -> softmax(q @ k^T) @ v, per (batch, head).

    Grid (bs, q_tiles, kv_tiles); kv innermost 'arbitrary' with resident output
    block + f32 scratch accumulators.  When S fits a single kv tile the K/V
    blocks stay resident in VMEM across query tiles (no re-DMA).
    """
    bs, H, S, d_k = q.shape
    tq_prefs = (128,) if _is_v5e() else (256, 128)   # v5e MXU is 128-deep
    tq = _pick_tile(S, tq_prefs)
    tkv = _pick_tile(S, (512, 256, 128))
    grid = (bs, S // tq, S // tkv)
    return pl.pallas_call(
        _flash_kernel,
        out_shape=jax.ShapeDtypeStruct((bs, H, S, d_k), q.dtype),
        grid=grid,
        in_specs=[
            pl.BlockSpec((1, H, tq, d_k), lambda b, qi, ki: (b, 0, qi, 0)),
            pl.BlockSpec((1, H, tkv, d_k), lambda b, qi, ki: (b, 0, ki, 0)),
            pl.BlockSpec((1, H, tkv, d_k), lambda b, qi, ki: (b, 0, ki, 0)),
        ],
        out_specs=pl.BlockSpec((1, H, tq, d_k), lambda b, qi, ki: (b, 0, qi, 0)),
        scratch_shapes=[
            pltpu.VMEM((H, tq, 1), jnp.float32),     # running max m
            pltpu.VMEM((H, tq, 1), jnp.float32),     # running denom l
            pltpu.VMEM((H, tq, d_k), jnp.float32),   # output accumulator
        ],
        compiler_params=pltpu.CompilerParams(
            dimension_semantics=("parallel", "parallel", "arbitrary"),
            vmem_limit_bytes=_VMEM_LIMIT,
        ),
    )(q, k, v)


# --------------------------------- module wrapper ----------------------------------- #
class MultiHeadAttentionPallas:
    """Pallas-TPU forward of the reference MultiHeadAttention (Baseline, dropout=0)."""

    def __init__(self, heads, d_model, key, attention_type="Baseline",
                 compute_dtype=jnp.bfloat16):
        assert attention_type == "Baseline"
        assert d_model % heads == 0
        self.h = heads
        self.d_model = d_model
        self.d_k = d_model // heads
        self.compute_dtype = compute_dtype
        ks = jax.random.split(key, 8)
        s = 1.0 / math.sqrt(d_model)

        def u(kk, shape):
            return jax.random.uniform(kk, shape, jnp.float32, -s, s)

        scale = 1.0 / math.sqrt(self.d_k)
        # 1/sqrt(d_k) folded into the Q projection at construction time.
        self.w_q = u(ks[0], (d_model, d_model)) * scale
        self.b_q = u(ks[1], (1, d_model)) * scale
        self.w_k = u(ks[2], (d_model, d_model))
        self.b_k = u(ks[3], (1, d_model))
        self.w_v = u(ks[4], (d_model, d_model))
        self.b_v = u(ks[5], (1, d_model))
        self.w_out = u(ks[6], (d_model, d_model))
        self.b_out = u(ks[7], (1, d_model))
        # Fused (D, 3D) weights for the self-attention fast path (q is k is v):
        # a single wide matmul reads x once and avoids any stacking copy.
        self.w_qkv_cat = jnp.concatenate([self.w_q, self.w_k, self.w_v], axis=1)
        self.b_qkv_cat = jnp.concatenate([self.b_q, self.b_k, self.b_v], axis=1)

    def __call__(self, q, k, v, mask=None):
        # TODO(synk): mask path (masked_fill with -1e9) not wired in; mask=None only.
        assert mask is None
        bs, S, D = q.shape
        H, d_k, cd = self.h, self.d_k, self.compute_dtype

        if q is k and k is v:
            # Self-attention: one fused (M, D) @ (D, 3D) projection matmul.
            qkv = linear_pallas(q.reshape(bs * S, D), self.w_qkv_cat,
                                self.b_qkv_cat, out_dtype=cd, compute_dtype=cd)
            q_p, k_p, v_p = qkv[:, :D], qkv[:, D:2 * D], qkv[:, 2 * D:]
        else:
            q_p = linear_pallas(q.reshape(bs * S, D), self.w_q, self.b_q,
                                out_dtype=cd, compute_dtype=cd)
            k_p = linear_pallas(k.reshape(bs * S, D), self.w_k, self.b_k,
                                out_dtype=cd, compute_dtype=cd)
            v_p = linear_pallas(v.reshape(bs * S, D), self.w_v, self.b_v,
                                out_dtype=cd, compute_dtype=cd)

        def split_heads(x):
            return x.reshape(bs, S, H, d_k).transpose(0, 2, 1, 3)   # (bs, H, S, d_k)

        q_h, k_h, v_h = split_heads(q_p), split_heads(k_p), split_heads(v_p)

        # Reference arg swap: scores against v_proj, output matmul against k_proj.
        attn = flash_attention_pallas(q_h, v_h, k_h)                # (bs, H, S, d_k)

        concat = attn.transpose(0, 2, 1, 3).reshape(bs * S, D)
        out = linear_pallas(concat, self.w_out, self.b_out,
                            out_dtype=jnp.float32, compute_dtype=cd)
        return out.reshape(bs, S, D)


# ------------------------------------ reference -------------------------------------- #
def _reference(mha, q, k, v):
    """Pure-JAX f32 reference (1/sqrt(d_k) is already folded into w_q/b_q)."""
    bs, S, D = q.shape
    H, d_k = mha.h, mha.d_k

    def proj(x, w, b):
        return (x.reshape(bs * S, D) @ w + b).reshape(bs, S, H, d_k).transpose(0, 2, 1, 3)

    qp = proj(q, mha.w_q, mha.b_q)
    kp = proj(k, mha.w_k, mha.b_k)
    vp = proj(v, mha.w_v, mha.b_v)
    # Reference arg swap: scores against v_proj, output against k_proj.
    scores = jnp.einsum("bhqd,bhkd->bhqk", qp, vp)
    w = jax.nn.softmax(scores, axis=-1)
    out = jnp.einsum("bhqk,bhkd->bhqd", w, kp)
    concat = out.transpose(0, 2, 1, 3).reshape(bs * S, D)
    return (concat @ mha.w_out + mha.b_out).reshape(bs, S, D)


if __name__ == "__main__":
    key = jax.random.PRNGKey(0)
    k_param, k_q, k_k, k_v = jax.random.split(key, 4)

    bs, seq, d_model, heads = 2, 8, 32, 4
    mha = MultiHeadAttentionPallas(heads, d_model, k_param)

    q = jax.random.normal(k_q, (bs, seq, d_model), jnp.float32)
    k = jax.random.normal(k_k, (bs, seq, d_model), jnp.float32)
    v = jax.random.normal(k_v, (bs, seq, d_model), jnp.float32)

    # General path (q, k, v distinct).
    out = jax.block_until_ready(mha(q, k, v))
    ref = _reference(mha, q, k, v)
    assert out.shape == (bs, seq, d_model)
    err = float(jnp.max(jnp.abs(out - ref)))
    assert jnp.allclose(out, ref, atol=2e-2, rtol=2e-2), err   # bf16 MXU tolerance

    # Self-attention fast path (single fused (D, 3D) projection matmul).
    out_self = jax.block_until_ready(mha(q, q, q))
    ref_self = _reference(mha, q, q, q)
    err_self = float(jnp.max(jnp.abs(out_self - ref_self)))
    assert jnp.allclose(out_self, ref_self, atol=2e-2, rtol=2e-2), err_self

    print("KERNEL_OK")
</pallas_src>

<mosaic_0001>
module attributes {stable_mosaic.version = 11 : i64} {
  func.func @_linear_kernel(%arg0: i32, %arg1: i32, %arg2: i32, %arg3: memref<16x32xbf16, #tpu.memory_space<vmem>>, %arg4: memref<32x32xbf16, #tpu.memory_space<vmem>>, %arg5: memref<1x32xf32, #tpu.memory_space<vmem>>, %arg6: memref<16x32xbf16, #tpu.memory_space<vmem>>, %arg7: memref<16x32xf32, #tpu.memory_space<vmem>>) attributes {dimension_semantics = [#tpu.dimension_semantics<parallel>, #tpu.dimension_semantics<parallel>, #tpu.dimension_semantics<arbitrary>], iteration_bounds = array<i64: 1, 1, 1>, scalar_prefetch = 0 : i64, scratch_operands = 1 : i64, tpu.core_type = #tpu.core_type<tc>, window_params = [{transform_indices = @transform_0, window_bounds = array<i64: 16, 32>}, {transform_indices = @transform_1, window_bounds = array<i64: 32, 32>}, {transform_indices = @transform_2, window_bounds = array<i64: 1, 32>}, {transform_indices = @transform_3, window_bounds = array<i64: 16, 32>}]} {
    %c0_i32 = arith.constant 0 : i32
    %0 = arith.cmpi eq, %arg2, %c0_i32 : i32
    %1 = arith.extui %0 : i1 to i32
    %c0_i32_0 = arith.constant 0 : i32
    %2 = arith.cmpi ne, %1, %c0_i32_0 : i32
    scf.if %2 {
      %cst_10 = arith.constant 0.000000e+00 : f32
      %12 = vector.broadcast %cst_10 : f32 to vector<16x32xf32>
      %c0_11 = arith.constant 0 : index
      %c0_12 = arith.constant 0 : index
      %13 = vector.load %arg7[%c0_11, %c0_12] : memref<16x32xf32, #tpu.memory_space<vmem>>, vector<16x32xf32>
      tpu.vector_store %arg7[%c0_11, %c0_12], %12 {strides = array<i32>} : memref<16x32xf32, #tpu.memory_space<vmem>>, vector<16x32xf32>,
    } else {
    }
    %c0 = arith.constant 0 : index
    %c0_1 = arith.constant 0 : index
    %3 = vector.load %arg7[%c0, %c0_1] : memref<16x32xf32, #tpu.memory_space<vmem>>, vector<16x32xf32>
    %c0_2 = arith.constant 0 : index
    %c0_3 = arith.constant 0 : index
    %4 = vector.load %arg3[%c0_2, %c0_3] : memref<16x32xbf16, #tpu.memory_space<vmem>>, vector<16x32xbf16>
    %c0_4 = arith.constant 0 : index
    %c0_5 = arith.constant 0 : index
    %5 = vector.load %arg4[%c0_4, %c0_5] : memref<32x32xbf16, #tpu.memory_space<vmem>>, vector<32x32xbf16>
    %cst = arith.constant dense<0.000000e+00> : vector<16x32xf32>
    %6 = tpu.matmul %4, %5, %cst {dimension_numbers = #tpu.dot_dimension_numbers<[1], [0], [0], [1], [0, 0, 1, 1], [], []>} : vector<16x32xbf16>, vector<32x32xbf16>, vector<16x32xf32> -> vector<16x32xf32>
    %7 = arith.addf %3, %6 : vector<16x32xf32>
    %c0_6 = arith.constant 0 : index
    %c0_7 = arith.constant 0 : index
    %8 = vector.load %arg7[%c0_6, %c0_7] : memref<16x32xf32, #tpu.memory_space<vmem>>, vector<16x32xf32>
    tpu.vector_store %arg7[%c0_6, %c0_7], %7 {strides = array<i32>} : memref<16x32xf32, #tpu.memory_space<vmem>>, vector<16x32xf32>,
    %c0_i32_8 = arith.constant 0 : i32
    %9 = arith.cmpi eq, %arg2, %c0_i32_8 : i32
    %10 = arith.extui %9 : i1 to i32
    %c0_i32_9 = arith.constant 0 : i32
    %11 = arith.cmpi ne, %10, %c0_i32_9 : i32
    scf.if %11 {
      %c0_10 = arith.constant 0 : index
      %c0_11 = arith.constant 0 : index
      %12 = vector.load %arg7[%c0_10, %c0_11] : memref<16x32xf32, #tpu.memory_space<vmem>>, vector<16x32xf32>
      %c0_12 = arith.constant 0 : index
      %c0_13 = arith.constant 0 : index
      %13 = vector.load %arg5[%c0_12, %c0_13] : memref<1x32xf32, #tpu.memory_space<vmem>>, vector<1x32xf32>
      %14 = vector.broadcast %13 : vector<1x32xf32> to vector<16x32xf32>
      %15 = arith.addf %12, %14 : vector<16x32xf32>
      %16 = arith.truncf %15 : vector<16x32xf32> to vector<16x32xbf16>
      %c0_14 = arith.constant 0 : index
      %c0_15 = arith.constant 0 : index
      %17 = vector.load %arg6[%c0_14, %c0_15] : memref<16x32xbf16, #tpu.memory_space<vmem>>, vector<16x32xbf16>
      tpu.vector_store %arg6[%c0_14, %c0_15], %16 {strides = array<i32>} : memref<16x32xbf16, #tpu.memory_space<vmem>>, vector<16x32xbf16>,
    } else {
    }
    return
  }
  func.func @transform_0(%arg0: i32, %arg1: i32, %arg2: i32) -> (i32, i32) {
    %c0_i32 = arith.constant 0 : i32
    return %arg0, %arg2 : i32, i32
  }
  func.func @transform_1(%arg0: i32, %arg1: i32, %arg2: i32) -> (i32, i32) {
    %c0_i32 = arith.constant 0 : i32
    return %arg2, %arg1 : i32, i32
  }
  func.func @transform_2(%arg0: i32, %arg1: i32, %arg2: i32) -> (i32, i32) {
    %c0_i32 = arith.constant 0 : i32
    %c0_i32_0 = arith.constant 0 : i32
    return %c0_i32, %arg1 : i32, i32
  }
  func.func @transform_3(%arg0: i32, %arg1: i32, %arg2: i32) -> (i32, i32) {
    %c0_i32 = arith.constant 0 : i32
    return %arg0, %arg1 : i32, i32
  }
}

</mosaic_0001>

<bundles_post_ra>
// kernel: tpu_custom_call.1
= control target key start
LH: loop header
LB: loop body
LE: loop exit
PB: predicated region body
PF: predicated region fallthrough
CT: control target
= control target key end

     0   :  { %8 = vsyncpa [#allocation4], 0  ;;  %s291_s0 = inlined_call_operand.hbm [shape: bf16[16,32], index: 0, kind: input, shape index: {}]   ;;  %s292_s1 = inlined_call_operand.hbm [shape: bf16[32,32], index: 1, kind: input, shape index: {}]   ;;  %s293_s2 = inlined_call_operand.vmem [shape: f32[1,32], index: 2, kind: input, shape index: {}]   ;;  %s294_s3 = inlined_call_operand.hbm [shape: bf16[16,32], index: 3, kind: output, shape index: {}]  }
   0x1   :  { %9 = vsyncpa [#allocation7], 0 }
   0x2   :  { %10 = vsyncpa [#allocation5], 0  ;;  %s15_s14 = sshll.u32 %s291_s0, 4  ;;  %s239_s15 = smov [#allocation3]   ;;  %s16_s14 = int_to_ptr.hbm [resolvable:$true] %s15_s14 }
   0x3   :  { %s17_s16 = sshll.u32 %s239_s15, 4  ;;  %s28_s19 = sshll.u32 %s292_s1, 4  ;;  %s18_s16 = int_to_ptr.vmem [resolvable:$true] %s17_s16  ;;  %s29_s19 = int_to_ptr.hbm [resolvable:$true] %s28_s19 }
   0x4   :  { %s240_s20 = smov 64   ;;  %s241_s21 = smov 4  }
   0x5   :  { %23 = dma.hbm_to_vmem [thread:$0]  %s16_s14, 128, %s18_s16, [#allocation4], %s240_s20, %s240_s20, %s241_s21  }
   0x6   :  { %s242_s22 = smov [#allocation6]  }
   0x7   :  { %s30_s23 = sshll.u32 %s242_s22, 4  ;;  %s31_s23 = int_to_ptr.vmem [resolvable:$true] %s30_s23 }
   0x8   :  { %36 = dma.hbm_to_vmem [thread:$0]  %s29_s19, 256, %s31_s23, [#allocation7], %s240_s20, %s240_s20, %s241_s21  }
   0x9   :  { %233 = dma.done.wait [#allocation4], 128  }
   0xa   :  { %234 = vsyncadd [#allocation4], 4294967168 }
   0xb   :  { %235 = dma.done.wait [#allocation7], 256  }
   0xc   :  { %236 = vsyncadd [#allocation7], 4294967040  ;;  %vm52_vm0 = vcmask 261120   ;;  %v243_v0 = vmov 0.0   ;;  %v153_v1 = vld [vmem:[#allocation6 + $0x8] sm:$0xff]  ;;  %v152_v2 = vld [vmem:[#allocation6] sm:$0xff] }
   0xd   :  { %53 = vst.msk [vmem:[#allocation2] sm:$0xff] %vm52_vm0, %v243_v0  ;;  %90 = vmatpush.bf16.msra.mxu0 %v153_v1  ;;  %v151_v3 = vld [vmem:[#allocation3] sm:$0xff]  ;;  %v160_v8 = vld [vmem:[%s293_s2] ss:$0 sm:$0xff]  ;;  %vm115_vm1 = vcmask 257024   ;;  %s244_s24 = smov [#allocation8]  }
   0xe   :  { %54 = vst.msk [vmem:[#allocation2 + $0x8] sm:$0xff] %vm52_vm0, %v243_v0  ;;  %s122_s25 = sshll.u32 %s244_s24, 4  ;;  %s124_s28 = sshll.u32 %s294_s3, 4  ;;  %s123_s25 = int_to_ptr.vmem [resolvable:$true] %s122_s25  ;;  %s125_s28 = int_to_ptr.hbm [resolvable:$true] %s124_s28 }
  0x11   :  { %91 = vmatpush.bf16.msra.mxu0 %v152_v2 }
  0x14   :  { %150 = vmatmul.msk.bf16.vlgmr.msra.gmra.mxu0 %vm52_vm0, %v151_v3  ;;  %v55_v4 = vld [vmem:[#allocation2] sm:$0xff] }
  0x15   :  { %v56_v7 = vld [vmem:[#allocation2 + $0x8] sm:$0xff] }
  0x91   :  { %v93_v5 = vpop.f32.mrf.mxu0 }
  0x92   :  { %v98_v6 = vadd.f32 %v93_v5, %v55_v4 }
  0x94   :  { %100 = vst.msk [vmem:[#allocation2] sm:$0xff] %vm52_vm0, %v98_v6 }
  0x99   :  { %v95_v9 = vpop.f32.mrf.mxu0 }
  0x9a   :  { %v99_v10 = vadd.f32 %v95_v9, %v56_v7 }
  0x9b   :  { %v105_v11 = vld [vmem:[#allocation2] sm:$0xff] }
  0x9c   :  { %101 = vst.msk [vmem:[#allocation2 + $0x8] sm:$0xff] %vm52_vm0, %v99_v10  ;;  %v111_v12 = vadd.f32 %v160_v8, %v105_v11 }
  0x9e   :  { %v113_v13 = vpack.c.bf16 %v111_v12, %v111_v12 }
  0xa0   :  { %116 = vst.msk [vmem:[#allocation8] sm:$0xf] %vm115_vm1, %v113_v13 }
  0xa3   :  { %v106_v14 = vld [vmem:[#allocation2 + $0x8] sm:$0xff] }
  0xa4   :  { %v112_v15 = vadd.f32 %v160_v8, %v106_v14 }
  0xa6   :  { %v114_v16 = vpack.c.bf16 %v112_v15, %v112_v15 }
  0xa8   :  { %117 = vst.msk [vmem:[#allocation8 + $0x4] sm:$0xf] %vm115_vm1, %v114_v16 }
  0xa9   :  { %130 = dma.vmem_to_hbm [thread:$0]  %s123_s25, 128, %s125_s28, [#allocation5], %s240_s20, %s240_s20, %s241_s21  }
  0xaa   :  { %237 = dma.done.wait [#allocation5], 128  }
  0xab   :  { %238 = vsyncadd [#allocation5], 4294967168 }
  0xac   :  { %135 = vsyncpa [#allocation4], 1 }
  0xad   :  { %136 = vsyncpa [#allocation7], 1 }
  0xae   :  { %137 = vsyncpa [#allocation5], 1 }

</bundles_post_ra>
